<compile_context>
chip_gen: v5e
topology: v5e:2x2
jax: 0.10.0
libtpu: 0.0.40
codegen_flags: <defaults>
</compile_context>

<pallas_src>
import math

import jax
import jax.numpy as jnp
from jax.experimental import pallas as pl
from jax.experimental.pallas import tpu as pltpu


def _epsp_kernel(obs_ref, expand_ref, w_ref, b_ref, out_ref):
    # obs_ref:    (TB, K)   f32, streamed per grid step (K = k*obs_dim)
    # expand_ref: (K, Np)   f32 0/1 block-diagonal expansion, VMEM-resident
    # w_ref:      (1, Np)   f32, 0.5/std   (tiled k times), VMEM-resident
    # b_ref:      (1, Np)   f32, 0.5*mean/std (tiled k times), VMEM-resident
    # out_ref:    (TB, Np)  lane-dense packed output tile (Np % 128 == 0 when packed)
    obs_exp = jnp.dot(
        obs_ref[...],
        expand_ref[...],
        precision=jax.lax.Precision.HIGHEST,   # exact for a 0/1 matrix with f32 operands
        preferred_element_type=jnp.float32,
    )
    # sigmoid((x - mean)/std) = 0.5*tanh(x*(0.5/std) - 0.5*mean/std) + 0.5
    t = jnp.tanh(obs_exp * w_ref[...] - b_ref[...])
    out_ref[...] = (0.5 * t + 0.5).astype(out_ref.dtype)


def _vmem_capacity_bytes():
    try:
        cap = getattr(pltpu.get_tpu_info(), "vmem_capacity_bytes", None)
        if cap:
            return int(cap)
    except Exception:
        pass
    return 64 * 1024 * 1024  # conservative: v7x per-TC VMEM


def spine_epsp_encoder(obs, mean_encoder, std_encoder, *,
                       out_dtype=jnp.float32,
                       target_tile_bytes=None):
    """obs: (B, obs_dim); mean/std: (obs_dim, spine_dim) (leading 1 squeezed if present).

    Returns (B, obs_dim*spine_dim) = sigmoid((obs - mean) / std), row-major
    flattened, matching SpineEpspEncoderNoneEpsp1.forward.
    """
    B, obs_dim = obs.shape
    mean2 = jnp.asarray(mean_encoder, jnp.float32).reshape(obs_dim, -1)
    std2 = jnp.asarray(std_encoder, jnp.float32).reshape(obs_dim, -1)
    spine_dim = mean2.shape[-1]
    N = obs_dim * spine_dim

    # --- row-packing factor: fold k batch rows into one kernel row so the
    #     stored lane width k*N is a multiple of 128 (unmasked full-width stores).
    k = 128 // math.gcd(N, 128)
    if k > 1 and B % k != 0:
        # Fall back to unpacked (masked stores) rather than padding the batch
        # and paying a full-output slice copy in the wrapper.
        k = 1

    Bp = B // k
    K = k * obs_dim          # packed obs feature width
    Np = k * N               # packed (lane-dense) output width

    # --- precomputed per-column constants.
    inv_std = 1.0 / std2                                            # (obs_dim, spine_dim)
    w = jnp.tile((0.5 * inv_std).reshape(1, N), (1, k))             # (1, Np)
    b = jnp.tile((0.5 * mean2 * inv_std).reshape(1, N), (1, k))     # (1, Np)

    # --- 0/1 block-diagonal expansion: E[r*obs_dim+i, r*N + i*spine_dim + s] = 1
    rows = jnp.arange(K, dtype=jnp.int32)
    cols = jnp.arange(Np, dtype=jnp.int32)
    expand = (
        (rows[:, None] // obs_dim == cols[None, :] // N)
        & (rows[:, None] % obs_dim == (cols[None, :] % N) // spine_dim)
    ).astype(jnp.float32)                                           # (K, Np)

    obs_p = obs.astype(jnp.float32).reshape(Bp, K)   # contiguous, free reshape

    # --- VMEM-aware tiling (v5e/v6e: 128 MiB, v7x: 64 MiB per TC).
    vmem_cap = _vmem_capacity_bytes()
    out_itemsize = jnp.dtype(out_dtype).itemsize
    per_row_bytes = Np * out_itemsize + K * 4          # one output row + one obs row
    if target_tile_bytes is None:
        resident_bytes = 2 * (int(expand.size) + 2 * Np) * 4   # worst case: double-buffered
        budget = max(int(0.5 * vmem_cap) - resident_bytes, 2 * 1024 * 1024)
        target_tile_bytes = min(budget // 2, 8 * 1024 * 1024)
    tb = max(8, (int(target_tile_bytes) // per_row_bytes) // 8 * 8)
    tb = int(min(Bp, tb))
    # NOTE: for very large obs_dim (expansion matrix > ~1/3 of VMEM) a second
    # grid axis over Np would bound the resident slab; the module's typical
    # obs_dim (tens) never gets close, so it is intentionally omitted.

    grid = (pl.cdiv(Bp, tb),)
    vmem_limit = int(0.75 * vmem_cap)

    def _run(single_buffer_residents):
        if single_buffer_residents:
            # Grid-invariant inputs only need one VMEM buffer (halves their
            # footprint on v7x's 64 MiB VMEM).
            def res_spec(shape):
                return pl.BlockSpec(shape, lambda i: (0, 0),
                                    pipeline_mode=pl.Buffered(1))
        else:
            def res_spec(shape):
                return pl.BlockSpec(shape, lambda i: (0, 0))

        return pl.pallas_call(
            _epsp_kernel,
            out_shape=jax.ShapeDtypeStruct((Bp, Np), out_dtype),
            grid_spec=pltpu.PrefetchScalarGridSpec(
                num_scalar_prefetch=0,
                grid=grid,
                in_specs=[
                    pl.BlockSpec((tb, K), lambda i: (i, 0)),   # streamed obs tile
                    res_spec((K, Np)),                          # resident expand
                    res_spec((1, Np)),                          # resident w = 0.5/std
                    res_spec((1, Np)),                          # resident b = 0.5*mean/std
                ],
                out_specs=pl.BlockSpec((tb, Np), lambda i: (i, 0)),  # lane-dense out
            ),
            compiler_params=pltpu.CompilerParams(
                dimension_semantics=("parallel",),   # megacore sharding
                vmem_limit_bytes=vmem_limit,
            ),
        )(obs_p, expand, w, b)

    try:
        out_p = _run(True)
    except Exception:
        # pipeline_mode=pl.Buffered(1) not supported by this JAX/Mosaic version;
        # fall back to default double-buffered resident params.
        out_p = _run(False)

    # (Bp, k*N) -> (B, N): contiguous row-major reshape, no relayout.
    return out_p.reshape(B, N)


def make_params(obs_dim, spine_dim, mean_range, std):
    """Deterministic parameter init exactly as in the PyTorch __init__
    (leading broadcast dim of size 1 squeezed away)."""
    lo, hi = mean_range
    delta = (hi - lo) / (spine_dim - 1)
    means = lo + delta * jnp.arange(spine_dim, dtype=jnp.float32)        # (spine_dim,)
    mean_encoder = jnp.broadcast_to(means[None, :], (obs_dim, spine_dim))
    std_encoder = jnp.full((obs_dim, spine_dim), std, dtype=jnp.float32)
    return mean_encoder.astype(jnp.float32), std_encoder


if __name__ == "__main__":
    obs_dim = 4
    spine_dim = 16
    batch = 2
    mean_range = (-3.0, 3.0)
    std = 1.0

    key = jax.random.PRNGKey(0)
    obs = jax.random.normal(key, (batch, obs_dim), dtype=jnp.float32)
    mean_encoder, std_encoder = make_params(obs_dim, spine_dim, mean_range, std)

    def ref_fwd(o):
        return (
            1.0 / (1.0 + jnp.exp(-(o[:, :, None] - mean_encoder[None]) / std_encoder[None]))
        ).reshape(o.shape[0], obs_dim * spine_dim)

    # --- single-tile, row-packed path (N=64 -> k=2 -> 128-lane output) ---
    out = jax.block_until_ready(spine_epsp_encoder(obs, mean_encoder, std_encoder))
    ref = ref_fwd(obs)
    assert out.shape == (batch, obs_dim * spine_dim)
    assert jnp.allclose(out, ref, atol=1e-5, rtol=1e-5), float(jnp.max(jnp.abs(out - ref)))

    # --- multi-tile batch grid over packed rows (tb=8) ---
    obs_big = jax.random.normal(jax.random.PRNGKey(1), (64, obs_dim), dtype=jnp.float32)
    out_big = jax.block_until_ready(
        spine_epsp_encoder(obs_big, mean_encoder, std_encoder, target_tile_bytes=2048)
    )
    assert jnp.allclose(out_big, ref_fwd(obs_big), atol=1e-5, rtol=1e-5)

    # --- odd batch: row-packing falls back to k=1 (masked stores, still correct) ---
    obs_odd = jax.random.normal(jax.random.PRNGKey(2), (3, obs_dim), dtype=jnp.float32)
    out_odd = jax.block_until_ready(spine_epsp_encoder(obs_odd, mean_encoder, std_encoder))
    assert jnp.allclose(out_odd, ref_fwd(obs_odd), atol=1e-5, rtol=1e-5)

    # --- bf16 output option (halves HBM writeback when tolerated downstream) ---
    out_bf16 = jax.block_until_ready(
        spine_epsp_encoder(obs_big, mean_encoder, std_encoder, out_dtype=jnp.bfloat16)
    )
    assert out_bf16.dtype == jnp.bfloat16
    assert jnp.allclose(out_bf16.astype(jnp.float32), ref_fwd(obs_big), atol=1e-2, rtol=1e-2)

    print("KERNEL_OK")
</pallas_src>

<mosaic_0001>
module attributes {stable_mosaic.version = 11 : i64} {
  func.func @_epsp_kernel(%arg0: i32, %arg1: memref<1x8xf32, #tpu.memory_space<vmem>>, %arg2: memref<8x128xf32, #tpu.memory_space<vmem>>, %arg3: memref<1x128xf32, #tpu.memory_space<vmem>>, %arg4: memref<1x128xf32, #tpu.memory_space<vmem>>, %arg5: memref<1x128xf32, #tpu.memory_space<vmem>>) attributes {dimension_semantics = [#tpu.dimension_semantics<parallel>], iteration_bounds = array<i64: 1>, scalar_prefetch = 0 : i64, scratch_operands = 0 : i64, tpu.core_type = #tpu.core_type<tc>, window_params = [{transform_indices = @transform_0, window_bounds = array<i64: 1, 8>}, {pipeline_mode = #tpu.pipeline_mode<synchronous>, transform_indices = @transform_1, window_bounds = array<i64: 8, 128>}, {pipeline_mode = #tpu.pipeline_mode<synchronous>, transform_indices = @transform_2, window_bounds = array<i64: 1, 128>}, {pipeline_mode = #tpu.pipeline_mode<synchronous>, transform_indices = @transform_3, window_bounds = array<i64: 1, 128>}, {transform_indices = @transform_4, window_bounds = array<i64: 1, 128>}]} {
    %c0 = arith.constant 0 : index
    %c0_0 = arith.constant 0 : index
    %0 = vector.load %arg1[%c0, %c0_0] : memref<1x8xf32, #tpu.memory_space<vmem>>, vector<1x8xf32>
    %c0_1 = arith.constant 0 : index
    %c0_2 = arith.constant 0 : index
    %1 = vector.load %arg2[%c0_1, %c0_2] : memref<8x128xf32, #tpu.memory_space<vmem>>, vector<8x128xf32>
    %cst = arith.constant dense<0.000000e+00> : vector<1x128xf32>
    %2 = tpu.matmul %0, %1, %cst {dimension_numbers = #tpu.dot_dimension_numbers<[1], [0], [0], [1], [0, 0, 1, 1], [], []>, precision = #tpu.contract_precision<fp32>} : vector<1x8xf32>, vector<8x128xf32>, vector<1x128xf32> -> vector<1x128xf32>
    %c0_3 = arith.constant 0 : index
    %c0_4 = arith.constant 0 : index
    %3 = vector.load %arg3[%c0_3, %c0_4] : memref<1x128xf32, #tpu.memory_space<vmem>>, vector<1x128xf32>
    %4 = arith.mulf %2, %3 : vector<1x128xf32>
    %c0_5 = arith.constant 0 : index
    %c0_6 = arith.constant 0 : index
    %5 = vector.load %arg4[%c0_5, %c0_6] : memref<1x128xf32, #tpu.memory_space<vmem>>, vector<1x128xf32>
    %6 = arith.subf %4, %5 : vector<1x128xf32>
    %7 = math.tanh %6 : vector<1x128xf32>
    %cst_7 = arith.constant 5.000000e-01 : f32
    %8 = vector.broadcast %cst_7 : f32 to vector<1x128xf32>
    %9 = arith.mulf %8, %7 : vector<1x128xf32>
    %cst_8 = arith.constant 5.000000e-01 : f32
    %10 = vector.broadcast %cst_8 : f32 to vector<1x128xf32>
    %11 = arith.addf %9, %10 : vector<1x128xf32>
    %c0_9 = arith.constant 0 : index
    %c0_10 = arith.constant 0 : index
    %12 = vector.load %arg5[%c0_9, %c0_10] : memref<1x128xf32, #tpu.memory_space<vmem>>, vector<1x128xf32>
    tpu.vector_store %arg5[%c0_9, %c0_10], %11 {strides = array<i32>} : memref<1x128xf32, #tpu.memory_space<vmem>>, vector<1x128xf32>,
    return
  }
  func.func @transform_0(%arg0: i32) -> (i32, i32) {
    %c0_i32 = arith.constant 0 : i32
    %c0_i32_0 = arith.constant 0 : i32
    return %arg0, %c0_i32 : i32, i32
  }
  func.func @transform_1(%arg0: i32) -> (i32, i32) {
    %c0_i32 = arith.constant 0 : i32
    %c0_i32_0 = arith.constant 0 : i32
    %c0_i32_1 = arith.constant 0 : i32
    return %c0_i32, %c0_i32_0 : i32, i32
  }
  func.func @transform_2(%arg0: i32) -> (i32, i32) {
    %c0_i32 = arith.constant 0 : i32
    %c0_i32_0 = arith.constant 0 : i32
    %c0_i32_1 = arith.constant 0 : i32
    return %c0_i32, %c0_i32_0 : i32, i32
  }
  func.func @transform_3(%arg0: i32) -> (i32, i32) {
    %c0_i32 = arith.constant 0 : i32
    %c0_i32_0 = arith.constant 0 : i32
    %c0_i32_1 = arith.constant 0 : i32
    return %c0_i32, %c0_i32_0 : i32, i32
  }
  func.func @transform_4(%arg0: i32) -> (i32, i32) {
    %c0_i32 = arith.constant 0 : i32
    %c0_i32_0 = arith.constant 0 : i32
    return %arg0, %c0_i32 : i32, i32
  }
}

module attributes {stable_mosaic.version = 11 : i64} {
  func.func @_epsp_kernel(%arg0: i32, %arg1: memref<1x8xf32, #tpu.memory_space<vmem>>, %arg2: memref<8x128xf32, #tpu.memory_space<vmem>>, %arg3: memref<1x128xf32, #tpu.memory_space<vmem>>, %arg4: memref<1x128xf32, #tpu.memory_space<vmem>>, %arg5: memref<1x128xf32, #tpu.memory_space<vmem>>) attributes {dimension_semantics = [#tpu.dimension_semantics<parallel>], iteration_bounds = array<i64: 1>, scalar_prefetch = 0 : i64, scratch_operands = 0 : i64, tpu.core_type = #tpu.core_type<tc>, window_params = [{transform_indices = @transform_0, window_bounds = array<i64: 1, 8>}, {pipeline_mode = #tpu.pipeline_mode<synchronous>, transform_indices = @transform_1, window_bounds = array<i64: 8, 128>}, {pipeline_mode = #tpu.pipeline_mode<synchronous>, transform_indices = @transform_2, window_bounds = array<i64: 1, 128>}, {pipeline_mode = #tpu.pipeline_mode<synchronous>, transform_indices = @transform_3, window_bounds = array<i64: 1, 128>}, {transform_indices = @transform_4, window_bounds = array<i64: 1, 128>}]} {
    %c0 = arith.constant 0 : index
    %c0_0 = arith.constant 0 : index
    %0 = vector.load %arg1[%c0, %c0_0] : memref<1x8xf32, #tpu.memory_space<vmem>>, vector<1x8xf32>
    %c0_1 = arith.constant 0 : index
    %c0_2 = arith.constant 0 : index
    %1 = vector.load %arg2[%c0_1, %c0_2] : memref<8x128xf32, #tpu.memory_space<vmem>>, vector<8x128xf32>
    %cst = arith.constant dense<0.000000e+00> : vector<1x128xf32>
    %2 = tpu.matmul %0, %1, %cst {dimension_numbers = #tpu.dot_dimension_numbers<[1], [0], [0], [1], [0, 0, 1, 1], [], []>, precision = #tpu.contract_precision<fp32>} : vector<1x8xf32>, vector<8x128xf32>, vector<1x128xf32> -> vector<1x128xf32>
    %c0_3 = arith.constant 0 : index
    %c0_4 = arith.constant 0 : index
    %3 = vector.load %arg3[%c0_3, %c0_4] : memref<1x128xf32, #tpu.memory_space<vmem>>, vector<1x128xf32>
    %4 = arith.mulf %2, %3 : vector<1x128xf32>
    %c0_5 = arith.constant 0 : index
    %c0_6 = arith.constant 0 : index
    %5 = vector.load %arg4[%c0_5, %c0_6] : memref<1x128xf32, #tpu.memory_space<vmem>>, vector<1x128xf32>
    %6 = arith.subf %4, %5 : vector<1x128xf32>
    %7 = math.tanh %6 : vector<1x128xf32>
    %cst_7 = arith.constant 5.000000e-01 : f32
    %8 = vector.broadcast %cst_7 : f32 to vector<1x128xf32>
    %9 = arith.mulf %8, %7 : vector<1x128xf32>
    %cst_8 = arith.constant 5.000000e-01 : f32
    %10 = vector.broadcast %cst_8 : f32 to vector<1x128xf32>
    %11 = arith.addf %9, %10 : vector<1x128xf32>
    %c0_9 = arith.constant 0 : index
    %c0_10 = arith.constant 0 : index
    %12 = vector.load %arg5[%c0_9, %c0_10] : memref<1x128xf32, #tpu.memory_space<vmem>>, vector<1x128xf32>
    tpu.vector_store %arg5[%c0_9, %c0_10], %11 {strides = array<i32>} : memref<1x128xf32, #tpu.memory_space<vmem>>, vector<1x128xf32>,
    return
  }
  func.func @transform_0(%arg0: i32) -> (i32, i32) {
    %c0_i32 = arith.constant 0 : i32
    %c0_i32_0 = arith.constant 0 : i32
    return %arg0, %c0_i32 : i32, i32
  }
  func.func @transform_1(%arg0: i32) -> (i32, i32) {
    %c0_i32 = arith.constant 0 : i32
    %c0_i32_0 = arith.constant 0 : i32
    %c0_i32_1 = arith.constant 0 : i32
    return %c0_i32, %c0_i32_0 : i32, i32
  }
  func.func @transform_2(%arg0: i32) -> (i32, i32) {
    %c0_i32 = arith.constant 0 : i32
    %c0_i32_0 = arith.constant 0 : i32
    %c0_i32_1 = arith.constant 0 : i32
    return %c0_i32, %c0_i32_0 : i32, i32
  }
  func.func @transform_3(%arg0: i32) -> (i32, i32) {
    %c0_i32 = arith.constant 0 : i32
    %c0_i32_0 = arith.constant 0 : i32
    %c0_i32_1 = arith.constant 0 : i32
    return %c0_i32, %c0_i32_0 : i32, i32
  }
  func.func @transform_4(%arg0: i32) -> (i32, i32) {
    %c0_i32 = arith.constant 0 : i32
    %c0_i32_0 = arith.constant 0 : i32
    return %arg0, %c0_i32 : i32, i32
  }
}

</mosaic_0001>

<bundles_post_ra>
// kernel: tpu_custom_call.1
= control target key start
LH: loop header
LB: loop body
LE: loop exit
PB: predicated region body
PF: predicated region fallthrough
CT: control target
= control target key end

     0   :  { %9 = vsyncpa [#allocation3], 0  ;;  %s350_s0 = inlined_call_operand.hbm [shape: f32[1,8], index: 0, kind: input, shape index: {}]   ;;  %s351_s1 = inlined_call_operand.hbm [shape: f32[8,128], index: 1, kind: input, shape index: {}]   ;;  %s352_s2 = inlined_call_operand.vmem [shape: f32[1,128], index: 2, kind: input, shape index: {}]   ;;  %s353_s3 = inlined_call_operand.vmem [shape: f32[1,128], index: 3, kind: input, shape index: {}]   ;;  %s354_s4 = inlined_call_operand.hbm [shape: f32[1,128], index: 4, kind: output, shape index: {}]  }
   0x1   :  { %10 = vsyncpa [#allocation6], 0 }
   0x2   :  { %11 = vsyncpa [#allocation4], 0  ;;  %s17_s17 = sshll.u32 %s350_s0, 4  ;;  %s307_s18 = smov [#allocation2]   ;;  %s18_s17 = int_to_ptr.hbm [resolvable:$true] %s17_s17 }
   0x3   :  { %s19_s19 = sshll.u32 %s307_s18, 4  ;;  %s28_s22 = sshll.u32 %s351_s1, 4  ;;  %s20_s19 = int_to_ptr.vmem [resolvable:$true] %s19_s19  ;;  %s29_s22 = int_to_ptr.hbm [resolvable:$true] %s28_s22 }
   0x4   :  { %22 = dma.hbm_to_vmem [thread:$0]  %s18_s17, 16, %s20_s19, [#allocation3]  }
   0x5   :  { %s308_s23 = smov [#allocation5]  }
   0x6   :  { %s30_s24 = sshll.u32 %s308_s23, 4  ;;  %s31_s24 = int_to_ptr.vmem [resolvable:$true] %s30_s24 }
   0x7   :  { %33 = dma.hbm_to_vmem [thread:$0]  %s29_s22, 128, %s31_s24, [#allocation6]  }
   0x8   :  { %301 = dma.done.wait [#allocation3], 16  }
   0x9   :  { %302 = vsyncadd [#allocation3], 4294967280 }
   0xa   :  { %303 = dma.done.wait [#allocation6], 128  }
   0xb   :  { %304 = vsyncadd [#allocation6], 4294967168  ;;  %vm48_vm0 = vcmask 64512   ;;  %v47_v0 = vld [vmem:[#allocation5] sm:$0xff]  ;;  %v46_v1 = vld [vmem:[#allocation2] sm:$0x1] }
   0xc   :  { %v67_v2 = vand.u32 4294901760, %v47_v0  ;;  %v50_v3 = vsel %vm48_vm0, %v46_v1, 0  ;;  %v198_v23 = vld [vmem:[%s352_s2] sm:$0x1]  ;;  %s309_s27 = smov [#allocation7]   ;;  %s213_s5 = sshll.u32 %s354_s4, 4  ;;  %s214_s5 = int_to_ptr.hbm [resolvable:$true] %s213_s5 }
   0xd   :  { %v69_v4 = vand.u32 4294901760, %v50_v3  ;;  %v200_v25 = vld [vmem:[%s353_s3] sm:$0x1]  ;;  %s211_s28 = sshll.u32 %s309_s27, 4  ;;  %s212_s28 = int_to_ptr.vmem [resolvable:$true] %s211_s28 }
   0xe   :  { %v94_v5 = vsub.f32 %v47_v0, %v67_v2  ;;  %144 = vmatpush.msra.mxu3 %v67_v2  ;;  %68 = vmatpush.msra.mxu0 %v67_v2 }
   0xf   :  { %v70_v6 = vsub.f32 %v50_v3, %v69_v4 }
  0x10   :  { %121 = vmatpush.msra.mxu2 %v94_v5  ;;  %v95_v7 = vand.u32 4294901760, %v94_v5 }
  0x11   :  { %124 = vmatmul.f32.vlgmr.msra.gmra.mxu2 %v70_v6  ;;  %v71_v8 = vand.u32 4294901760, %v70_v6 }
  0x12   :  { %v96_v9 = vsub.f32 %v94_v5, %v95_v7  ;;  %170 = vmatpush.msrb.mxu0 %v95_v7 }
  0x13   :  { %148 = vmatmul.f32.vlgmr.msra.gmra.mxu3 %v71_v8  ;;  %v72_v10 = vsub.f32 %v70_v6, %v71_v8 }
  0x14   :  { %v97_v11 = vand.u32 4294901760, %v96_v9 }
  0x15   :  { %v73_v12 = vand.u32 4294901760, %v72_v10 }
  0x16   :  { %98 = vmatpush.msra.mxu1 %v97_v11 }
  0x17   :  { %74 = vmatmul.f32.vlgmr.msra.gmra.mxu0 %v73_v12  ;;  %100 = vmatmul.f32.vlgmr.msra.gmra.mxu1 %v69_v4 }
  0x18   :  { %192 = vmatpush.msrb.mxu1 %v67_v2 }
  0x1f   :  { %172 = vmatmul.f32.vlgmr.msrb.gmra.mxu0 %v69_v4  ;;  %194 = vmatmul.f32.vlgmr.msrb.gmra.mxu1 %v69_v4 }
  0x94   :  { %v75_v13 = vpop.f32.mrf.mxu0  ;;  %v101_v14 = vpop.f32.mrf.mxu1 }
  0x95   :  { %v102_v15 = vadd.f32 %v101_v14, %v75_v13  ;;  %v125_v16 = vpop.f32.mrf.mxu2 }
  0x96   :  { %v149_v18 = vpop.f32.mrf.mxu3 }
  0x97   :  { %v126_v17 = vadd.f32 %v125_v16, %v102_v15 }
  0x99   :  { %v150_v19 = vadd.f32 %v149_v18, %v126_v17 }
  0x9c   :  { %v173_v20 = vpop.f32.mrf.mxu0  ;;  %v195_v21 = vpop.f32.mrf.mxu1 }
  0x9d   :  { %v174_v22 = vadd.f32 %v173_v20, %v150_v19 }
  0x9f   :  { %v196_v24 = vadd.f32 %v195_v21, %v174_v22 }
  0xa1   :  { %v199_v26 = vmul.f32 %v198_v23, %v196_v24 }
  0xa3   :  { %v201_v27 = vsub.f32 %v199_v26, %v200_v25 }
  0xa5   :  { %227 = vtanh.f32 %v201_v27 }
  0xab   :  { %v228_v28 = vpop.eup %227 }
  0xac   :  { %v203_v29 = vmul.f32 0.5, %v228_v28 }
  0xae   :  { %v204_v30 = vadd.f32 0.5, %v203_v29 }
  0xb0   :  { %205 = vst [vmem:[#allocation7] sm:$0x1] %v204_v30 }
  0xb1   :  { %216 = dma.vmem_to_hbm [thread:$0]  %s212_s28, 16, %s214_s5, [#allocation4]  }
  0xb2   :  { %305 = dma.done.wait [#allocation4], 16  }
  0xb3   :  { %306 = vsyncadd [#allocation4], 4294967280 }
  0xb4   :  { %221 = vsyncpa [#allocation3], 1 }
  0xb5   :  { %222 = vsyncpa [#allocation6], 1 }
  0xb6   :  { %223 = vsyncpa [#allocation4], 1 }

// kernel: tpu_custom_call.1
= control target key start
LH: loop header
LB: loop body
LE: loop exit
PB: predicated region body
PF: predicated region fallthrough
CT: control target
= control target key end

     0   :  { %9 = vsyncpa [#allocation3], 0  ;;  %s350_s0 = inlined_call_operand.hbm [shape: f32[1,8], index: 0, kind: input, shape index: {}]   ;;  %s351_s1 = inlined_call_operand.hbm [shape: f32[8,128], index: 1, kind: input, shape index: {}]   ;;  %s352_s2 = inlined_call_operand.vmem [shape: f32[1,128], index: 2, kind: input, shape index: {}]   ;;  %s353_s3 = inlined_call_operand.vmem [shape: f32[1,128], index: 3, kind: input, shape index: {}]   ;;  %s354_s4 = inlined_call_operand.hbm [shape: f32[1,128], index: 4, kind: output, shape index: {}]  }
   0x1   :  { %10 = vsyncpa [#allocation6], 0 }
   0x2   :  { %11 = vsyncpa [#allocation4], 0  ;;  %s17_s17 = sshll.u32 %s350_s0, 4  ;;  %s307_s18 = smov [#allocation2]   ;;  %s18_s17 = int_to_ptr.hbm [resolvable:$true] %s17_s17 }
   0x3   :  { %s19_s19 = sshll.u32 %s307_s18, 4  ;;  %s28_s22 = sshll.u32 %s351_s1, 4  ;;  %s20_s19 = int_to_ptr.vmem [resolvable:$true] %s19_s19  ;;  %s29_s22 = int_to_ptr.hbm [resolvable:$true] %s28_s22 }
   0x4   :  { %22 = dma.hbm_to_vmem [thread:$0]  %s18_s17, 16, %s20_s19, [#allocation3]  }
   0x5   :  { %s308_s23 = smov [#allocation5]  }
   0x6   :  { %s30_s24 = sshll.u32 %s308_s23, 4  ;;  %s31_s24 = int_to_ptr.vmem [resolvable:$true] %s30_s24 }
   0x7   :  { %33 = dma.hbm_to_vmem [thread:$0]  %s29_s22, 128, %s31_s24, [#allocation6]  }
   0x8   :  { %301 = dma.done.wait [#allocation3], 16  }
   0x9   :  { %302 = vsyncadd [#allocation3], 4294967280 }
   0xa   :  { %303 = dma.done.wait [#allocation6], 128  }
   0xb   :  { %304 = vsyncadd [#allocation6], 4294967168  ;;  %vm48_vm0 = vcmask 64512   ;;  %v47_v0 = vld [vmem:[#allocation5] sm:$0xff]  ;;  %v46_v1 = vld [vmem:[#allocation2] sm:$0x1] }
   0xc   :  { %v67_v2 = vand.u32 4294901760, %v47_v0  ;;  %v50_v3 = vsel %vm48_vm0, %v46_v1, 0  ;;  %v198_v23 = vld [vmem:[%s352_s2] sm:$0x1]  ;;  %s309_s27 = smov [#allocation7]   ;;  %s213_s5 = sshll.u32 %s354_s4, 4  ;;  %s214_s5 = int_to_ptr.hbm [resolvable:$true] %s213_s5 }
   0xd   :  { %v69_v4 = vand.u32 4294901760, %v50_v3  ;;  %v200_v25 = vld [vmem:[%s353_s3] sm:$0x1]  ;;  %s211_s28 = sshll.u32 %s309_s27, 4  ;;  %s212_s28 = int_to_ptr.vmem [resolvable:$true] %s211_s28 }
   0xe   :  { %v94_v5 = vsub.f32 %v47_v0, %v67_v2  ;;  %144 = vmatpush.msra.mxu3 %v67_v2  ;;  %68 = vmatpush.msra.mxu0 %v67_v2 }
   0xf   :  { %v70_v6 = vsub.f32 %v50_v3, %v69_v4 }
  0x10   :  { %121 = vmatpush.msra.mxu2 %v94_v5  ;;  %v95_v7 = vand.u32 4294901760, %v94_v5 }
  0x11   :  { %124 = vmatmul.f32.vlgmr.msra.gmra.mxu2 %v70_v6  ;;  %v71_v8 = vand.u32 4294901760, %v70_v6 }
  0x12   :  { %v96_v9 = vsub.f32 %v94_v5, %v95_v7  ;;  %170 = vmatpush.msrb.mxu0 %v95_v7 }
  0x13   :  { %148 = vmatmul.f32.vlgmr.msra.gmra.mxu3 %v71_v8  ;;  %v72_v10 = vsub.f32 %v70_v6, %v71_v8 }
  0x14   :  { %v97_v11 = vand.u32 4294901760, %v96_v9 }
  0x15   :  { %v73_v12 = vand.u32 4294901760, %v72_v10 }
  0x16   :  { %98 = vmatpush.msra.mxu1 %v97_v11 }
  0x17   :  { %74 = vmatmul.f32.vlgmr.msra.gmra.mxu0 %v73_v12  ;;  %100 = vmatmul.f32.vlgmr.msra.gmra.mxu1 %v69_v4 }
  0x18   :  { %192 = vmatpush.msrb.mxu1 %v67_v2 }
  0x1f   :  { %172 = vmatmul.f32.vlgmr.msrb.gmra.mxu0 %v69_v4  ;;  %194 = vmatmul.f32.vlgmr.msrb.gmra.mxu1 %v69_v4 }
  0x94   :  { %v75_v13 = vpop.f32.mrf.mxu0  ;;  %v101_v14 = vpop.f32.mrf.mxu1 }
  0x95   :  { %v102_v15 = vadd.f32 %v101_v14, %v75_v13  ;;  %v125_v16 = vpop.f32.mrf.mxu2 }
  0x96   :  { %v149_v18 = vpop.f32.mrf.mxu3 }
  0x97   :  { %v126_v17 = vadd.f32 %v125_v16, %v102_v15 }
  0x99   :  { %v150_v19 = vadd.f32 %v149_v18, %v126_v17 }
  0x9c   :  { %v173_v20 = vpop.f32.mrf.mxu0  ;;  %v195_v21 = vpop.f32.mrf.mxu1 }
  0x9d   :  { %v174_v22 = vadd.f32 %v173_v20, %v150_v19 }
  0x9f   :  { %v196_v24 = vadd.f32 %v195_v21, %v174_v22 }
  0xa1   :  { %v199_v26 = vmul.f32 %v198_v23, %v196_v24 }
  0xa3   :  { %v201_v27 = vsub.f32 %v199_v26, %v200_v25 }
  0xa5   :  { %227 = vtanh.f32 %v201_v27 }
  0xab   :  { %v228_v28 = vpop.eup %227 }
  0xac   :  { %v203_v29 = vmul.f32 0.5, %v228_v28 }
  0xae   :  { %v204_v30 = vadd.f32 0.5, %v203_v29 }
  0xb0   :  { %205 = vst [vmem:[#allocation7] sm:$0x1] %v204_v30 }
  0xb1   :  { %216 = dma.vmem_to_hbm [thread:$0]  %s212_s28, 16, %s214_s5, [#allocation4]  }
  0xb2   :  { %305 = dma.done.wait [#allocation4], 16  }
  0xb3   :  { %306 = vsyncadd [#allocation4], 4294967280 }
  0xb4   :  { %221 = vsyncpa [#allocation3], 1 }
  0xb5   :  { %222 = vsyncpa [#allocation6], 1 }
  0xb6   :  { %223 = vsyncpa [#allocation4], 1 }

</bundles_post_ra>
